<compile_context>
chip_gen: v7x
topology: tpu7x:2x2x1
jax: 0.10.0
libtpu: 0.0.40
codegen_flags: <defaults>
</compile_context>

<pallas_src>
import functools

import jax
import jax.numpy as jnp
from jax.experimental import pallas as pl
from jax.experimental.pallas import tpu as pltpu

LANE = 128
SUBLANE = 8


def _round_up(n, m):
    return ((n + m - 1) // m) * m


# ---------------------------------------------------------------------------
# Kernel: one batch tile of the whole 4-layer MLP.
# Weights/biases are full-array VMEM blocks (resident across grid steps).
# ---------------------------------------------------------------------------
def _mlp_kernel(x_ref,
                w1_ref, b1_ref,
                w2_ref, b2_ref,
                w3_ref, b3_ref,
                w4_ref, b4_ref,
                o_ref):
    # Layer 1: Linear(input_size -> input_size // 2) + ReLU
    h = jnp.dot(x_ref[...], w1_ref[...], preferred_element_type=jnp.float32)
    h = jnp.maximum(h + b1_ref[...], 0.0).astype(w2_ref.dtype)

    # Layer 2: Linear(input_size // 2 -> input_size // 4) + ReLU
    h = jnp.dot(h, w2_ref[...], preferred_element_type=jnp.float32)
    h = jnp.maximum(h + b2_ref[...], 0.0).astype(w3_ref.dtype)

    # Layer 3: Linear(input_size // 4 -> input_size // 8) + ReLU
    h = jnp.dot(h, w3_ref[...], preferred_element_type=jnp.float32)
    h = jnp.maximum(h + b3_ref[...], 0.0).astype(w4_ref.dtype)

    # Layer 4: Linear(input_size // 8 -> out_pad), no activation (lane-padded)
    out = jnp.dot(h, w4_ref[...], preferred_element_type=jnp.float32) + b4_ref[...]
    o_ref[...] = out.astype(o_ref.dtype)


# ---------------------------------------------------------------------------
# One-time parameter preparation (layout + dtype), NOT on the forward path.
#   torch-style params: w_i is (out, in) float32, b_i is (out,) float32
#   kernel params:      w_i is (in, out) compute_dtype, b_i is (1, out) float32
#   Last layer columns are zero-padded to a multiple of 128 (lane-dense output).
# ---------------------------------------------------------------------------
def prepare_params(torch_params, output_size, compute_dtype=jnp.bfloat16):
    out_pad = _round_up(output_size, LANE)
    kp = {}
    for i in range(1, 5):
        w = jnp.asarray(torch_params[f"w{i}"], jnp.float32).T          # (in, out)
        b = jnp.asarray(torch_params[f"b{i}"], jnp.float32).reshape(1, -1)
        if i == 4:
            pad = out_pad - output_size
            w = jnp.pad(w, ((0, 0), (0, pad)))
            b = jnp.pad(b, ((0, 0), (0, pad)))
        kp[f"w{i}"] = w.astype(compute_dtype)   # bf16 weight stream (HBM bytes /2)
        kp[f"b{i}"] = b                         # biases stay f32 (f32 bias/ReLU path)
    return kp


# ---------------------------------------------------------------------------
# Forward pass (jitted): pad batch, tile it over a parallel grid, slice back.
# ---------------------------------------------------------------------------
@functools.partial(jax.jit, static_argnames=("out_size", "tile_batch"))
def bmps_approximator_forward(x, kparams, out_size, tile_batch=512):
    batch, in_size = x.shape
    out_pad = kparams["w4"].shape[1]

    # Tile size: multiple of 8, no larger than needed, capped at tile_batch.
    tb = min(tile_batch, _round_up(batch, SUBLANE))
    padded_batch = _round_up(batch, tb)
    if padded_batch != batch:
        x = jnp.pad(x, ((0, padded_batch - batch), (0, 0)))
    x = x.astype(kparams["w1"].dtype)

    w1, b1 = kparams["w1"], kparams["b1"]
    w2, b2 = kparams["w2"], kparams["b2"]
    w3, b3 = kparams["w3"], kparams["b3"]
    w4, b4 = kparams["w4"], kparams["b4"]

    resident = lambda a: pl.BlockSpec(a.shape, lambda i: (0, 0))  # VMEM-resident

    out = pl.pallas_call(
        _mlp_kernel,
        out_shape=jax.ShapeDtypeStruct((padded_batch, out_pad), jnp.float32),
        grid=(padded_batch // tb,),
        in_specs=[
            pl.BlockSpec((tb, in_size), lambda i: (i, 0)),   # streamed X tile
            resident(w1), resident(b1),
            resident(w2), resident(b2),
            resident(w3), resident(b3),
            resident(w4), resident(b4),
        ],
        out_specs=pl.BlockSpec((tb, out_pad), lambda i: (i, 0)),
        compiler_params=pltpu.CompilerParams(
            dimension_semantics=("parallel",)),              # v7x: 2 TCs share batch
    )(x, w1, b1, w2, b2, w3, b3, w4, b4)

    return out[:batch, :out_size]


# ---------------------------------------------------------------------------
# Deterministic init mimicking nn.Linear default (uniform +-1/sqrt(fan_in)),
# in PyTorch layout; converted once by prepare_params.
# ---------------------------------------------------------------------------
def init_params(key, input_size, output_size):
    dims = [input_size, input_size // 2, input_size // 4, input_size // 8, output_size]
    params = {}
    keys = jax.random.split(key, 8)
    for i in range(4):
        fan_in, fan_out = dims[i], dims[i + 1]
        bound = 1.0 / jnp.sqrt(jnp.float32(fan_in))
        params[f"w{i+1}"] = jax.random.uniform(
            keys[2 * i], (fan_out, fan_in), jnp.float32, -bound, bound)
        params[f"b{i+1}"] = jax.random.uniform(
            keys[2 * i + 1], (fan_out,), jnp.float32, -bound, bound)
    return params


def reference_forward(x, kparams, out_size):
    """Pure-JAX reference with the same dtype policy as the kernel."""
    h = x.astype(kparams["w1"].dtype)
    for i in range(1, 4):
        h = jnp.dot(h, kparams[f"w{i}"], preferred_element_type=jnp.float32)
        h = jnp.maximum(h + kparams[f"b{i}"], 0.0).astype(kparams[f"w{i+1}"].dtype)
    out = jnp.dot(h, kparams["w4"], preferred_element_type=jnp.float32) + kparams["b4"]
    return out[:, :out_size]


if __name__ == "__main__":
    key = jax.random.PRNGKey(0)
    input_size = 32      # hidden dims: 16, 8, 4
    output_size = 4
    batch = 8

    k_x, k_p = jax.random.split(key)
    x = jax.random.normal(k_x, (batch, input_size), jnp.float32)

    torch_style = init_params(k_p, input_size, output_size)
    kparams = prepare_params(torch_style, output_size)      # one-time layout/dtype prep

    out = bmps_approximator_forward(x, kparams, output_size)
    out = jax.block_until_ready(out)

    ref = reference_forward(x, kparams, output_size)
    assert out.shape == (batch, output_size), out.shape
    assert jnp.allclose(out, ref, atol=5e-3, rtol=5e-3), "mismatch vs reference"

    print("KERNEL_OK")
</pallas_src>

<mosaic_0001>
module attributes {stable_mosaic.version = 11 : i64} {
  func.func @_mlp_kernel(%arg0: i32, %arg1: memref<8x32xbf16, #tpu.memory_space<vmem>>, %arg2: memref<32x16xbf16, #tpu.memory_space<vmem>>, %arg3: memref<1x16xf32, #tpu.memory_space<vmem>>, %arg4: memref<16x8xbf16, #tpu.memory_space<vmem>>, %arg5: memref<1x8xf32, #tpu.memory_space<vmem>>, %arg6: memref<8x4xbf16, #tpu.memory_space<vmem>>, %arg7: memref<1x4xf32, #tpu.memory_space<vmem>>, %arg8: memref<4x128xbf16, #tpu.memory_space<vmem>>, %arg9: memref<1x128xf32, #tpu.memory_space<vmem>>, %arg10: memref<8x128xf32, #tpu.memory_space<vmem>>) attributes {dimension_semantics = [#tpu.dimension_semantics<parallel>], iteration_bounds = array<i64: 1>, scalar_prefetch = 0 : i64, scratch_operands = 0 : i64, tpu.core_type = #tpu.core_type<tc>, window_params = [{transform_indices = @transform_0, window_bounds = array<i64: 8, 32>}, {pipeline_mode = #tpu.pipeline_mode<synchronous>, transform_indices = @transform_1, window_bounds = array<i64: 32, 16>}, {pipeline_mode = #tpu.pipeline_mode<synchronous>, transform_indices = @transform_2, window_bounds = array<i64: 1, 16>}, {pipeline_mode = #tpu.pipeline_mode<synchronous>, transform_indices = @transform_3, window_bounds = array<i64: 16, 8>}, {pipeline_mode = #tpu.pipeline_mode<synchronous>, transform_indices = @transform_4, window_bounds = array<i64: 1, 8>}, {pipeline_mode = #tpu.pipeline_mode<synchronous>, transform_indices = @transform_5, window_bounds = array<i64: 8, 4>}, {pipeline_mode = #tpu.pipeline_mode<synchronous>, transform_indices = @transform_6, window_bounds = array<i64: 1, 4>}, {pipeline_mode = #tpu.pipeline_mode<synchronous>, transform_indices = @transform_7, window_bounds = array<i64: 4, 128>}, {pipeline_mode = #tpu.pipeline_mode<synchronous>, transform_indices = @transform_8, window_bounds = array<i64: 1, 128>}, {transform_indices = @transform_9, window_bounds = array<i64: 8, 128>}]} {
    %c0 = arith.constant 0 : index
    %c0_0 = arith.constant 0 : index
    %0 = vector.load %arg1[%c0, %c0_0] : memref<8x32xbf16, #tpu.memory_space<vmem>>, vector<8x32xbf16>
    %c0_1 = arith.constant 0 : index
    %c0_2 = arith.constant 0 : index
    %1 = vector.load %arg2[%c0_1, %c0_2] : memref<32x16xbf16, #tpu.memory_space<vmem>>, vector<32x16xbf16>
    %cst = arith.constant dense<0.000000e+00> : vector<8x16xf32>
    %2 = tpu.matmul %0, %1, %cst {dimension_numbers = #tpu.dot_dimension_numbers<[1], [0], [0], [1], [0, 0, 1, 1], [], []>} : vector<8x32xbf16>, vector<32x16xbf16>, vector<8x16xf32> -> vector<8x16xf32>
    %c0_3 = arith.constant 0 : index
    %c0_4 = arith.constant 0 : index
    %3 = vector.load %arg3[%c0_3, %c0_4] : memref<1x16xf32, #tpu.memory_space<vmem>>, vector<1x16xf32>
    %4 = vector.broadcast %3 : vector<1x16xf32> to vector<8x16xf32>
    %5 = arith.addf %2, %4 : vector<8x16xf32>
    %cst_5 = arith.constant 0.000000e+00 : f32
    %6 = vector.broadcast %cst_5 : f32 to vector<8x16xf32>
    %7 = arith.maximumf %5, %6 : vector<8x16xf32>
    %8 = arith.truncf %7 : vector<8x16xf32> to vector<8x16xbf16>
    %c0_6 = arith.constant 0 : index
    %c0_7 = arith.constant 0 : index
    %9 = vector.load %arg4[%c0_6, %c0_7] : memref<16x8xbf16, #tpu.memory_space<vmem>>, vector<16x8xbf16>
    %cst_8 = arith.constant dense<0.000000e+00> : vector<8x8xf32>
    %10 = tpu.matmul %8, %9, %cst_8 {dimension_numbers = #tpu.dot_dimension_numbers<[1], [0], [0], [1], [0, 0, 1, 1], [], []>} : vector<8x16xbf16>, vector<16x8xbf16>, vector<8x8xf32> -> vector<8x8xf32>
    %c0_9 = arith.constant 0 : index
    %c0_10 = arith.constant 0 : index
    %11 = vector.load %arg5[%c0_9, %c0_10] : memref<1x8xf32, #tpu.memory_space<vmem>>, vector<1x8xf32>
    %12 = vector.broadcast %11 : vector<1x8xf32> to vector<8x8xf32>
    %13 = arith.addf %10, %12 : vector<8x8xf32>
    %cst_11 = arith.constant 0.000000e+00 : f32
    %14 = vector.broadcast %cst_11 : f32 to vector<8x8xf32>
    %15 = arith.maximumf %13, %14 : vector<8x8xf32>
    %16 = arith.truncf %15 : vector<8x8xf32> to vector<8x8xbf16>
    %c0_12 = arith.constant 0 : index
    %c0_13 = arith.constant 0 : index
    %17 = vector.load %arg6[%c0_12, %c0_13] : memref<8x4xbf16, #tpu.memory_space<vmem>>, vector<8x4xbf16>
    %cst_14 = arith.constant dense<0.000000e+00> : vector<8x4xf32>
    %18 = tpu.matmul %16, %17, %cst_14 {dimension_numbers = #tpu.dot_dimension_numbers<[1], [0], [0], [1], [0, 0, 1, 1], [], []>} : vector<8x8xbf16>, vector<8x4xbf16>, vector<8x4xf32> -> vector<8x4xf32>
    %c0_15 = arith.constant 0 : index
    %c0_16 = arith.constant 0 : index
    %19 = vector.load %arg7[%c0_15, %c0_16] : memref<1x4xf32, #tpu.memory_space<vmem>>, vector<1x4xf32>
    %20 = vector.broadcast %19 : vector<1x4xf32> to vector<8x4xf32>
    %21 = arith.addf %18, %20 : vector<8x4xf32>
    %cst_17 = arith.constant 0.000000e+00 : f32
    %22 = vector.broadcast %cst_17 : f32 to vector<8x4xf32>
    %23 = arith.maximumf %21, %22 : vector<8x4xf32>
    %24 = arith.truncf %23 : vector<8x4xf32> to vector<8x4xbf16>
    %c0_18 = arith.constant 0 : index
    %c0_19 = arith.constant 0 : index
    %25 = vector.load %arg8[%c0_18, %c0_19] : memref<4x128xbf16, #tpu.memory_space<vmem>>, vector<4x128xbf16>
    %cst_20 = arith.constant dense<0.000000e+00> : vector<8x128xf32>
    %26 = tpu.matmul %24, %25, %cst_20 {dimension_numbers = #tpu.dot_dimension_numbers<[1], [0], [0], [1], [0, 0, 1, 1], [], []>} : vector<8x4xbf16>, vector<4x128xbf16>, vector<8x128xf32> -> vector<8x128xf32>
    %c0_21 = arith.constant 0 : index
    %c0_22 = arith.constant 0 : index
    %27 = vector.load %arg9[%c0_21, %c0_22] : memref<1x128xf32, #tpu.memory_space<vmem>>, vector<1x128xf32>
    %28 = vector.broadcast %27 : vector<1x128xf32> to vector<8x128xf32>
    %29 = arith.addf %26, %28 : vector<8x128xf32>
    %c0_23 = arith.constant 0 : index
    %c0_24 = arith.constant 0 : index
    %30 = vector.load %arg10[%c0_23, %c0_24] : memref<8x128xf32, #tpu.memory_space<vmem>>, vector<8x128xf32>
    tpu.vector_store %arg10[%c0_23, %c0_24], %29 {strides = array<i32>} : memref<8x128xf32, #tpu.memory_space<vmem>>, vector<8x128xf32>,
    return
  }
  func.func @transform_0(%arg0: i32) -> (i32, i32) {
    %c0_i32 = arith.constant 0 : i32
    %c0_i32_0 = arith.constant 0 : i32
    return %arg0, %c0_i32 : i32, i32
  }
  func.func @transform_1(%arg0: i32) -> (i32, i32) {
    %c0_i32 = arith.constant 0 : i32
    %c0_i32_0 = arith.constant 0 : i32
    %c0_i32_1 = arith.constant 0 : i32
    return %c0_i32, %c0_i32_0 : i32, i32
  }
  func.func @transform_2(%arg0: i32) -> (i32, i32) {
    %c0_i32 = arith.constant 0 : i32
    %c0_i32_0 = arith.constant 0 : i32
    %c0_i32_1 = arith.constant 0 : i32
    return %c0_i32, %c0_i32_0 : i32, i32
  }
  func.func @transform_3(%arg0: i32) -> (i32, i32) {
    %c0_i32 = arith.constant 0 : i32
    %c0_i32_0 = arith.constant 0 : i32
    %c0_i32_1 = arith.constant 0 : i32
    return %c0_i32, %c0_i32_0 : i32, i32
  }
  func.func @transform_4(%arg0: i32) -> (i32, i32) {
    %c0_i32 = arith.constant 0 : i32
    %c0_i32_0 = arith.constant 0 : i32
    %c0_i32_1 = arith.constant 0 : i32
    return %c0_i32, %c0_i32_0 : i32, i32
  }
  func.func @transform_5(%arg0: i32) -> (i32, i32) {
    %c0_i32 = arith.constant 0 : i32
    %c0_i32_0 = arith.constant 0 : i32
    %c0_i32_1 = arith.constant 0 : i32
    return %c0_i32, %c0_i32_0 : i32, i32
  }
  func.func @transform_6(%arg0: i32) -> (i32, i32) {
    %c0_i32 = arith.constant 0 : i32
    %c0_i32_0 = arith.constant 0 : i32
    %c0_i32_1 = arith.constant 0 : i32
    return %c0_i32, %c0_i32_0 : i32, i32
  }
  func.func @transform_7(%arg0: i32) -> (i32, i32) {
    %c0_i32 = arith.constant 0 : i32
    %c0_i32_0 = arith.constant 0 : i32
    %c0_i32_1 = arith.constant 0 : i32
    return %c0_i32, %c0_i32_0 : i32, i32
  }
  func.func @transform_8(%arg0: i32) -> (i32, i32) {
    %c0_i32 = arith.constant 0 : i32
    %c0_i32_0 = arith.constant 0 : i32
    %c0_i32_1 = arith.constant 0 : i32
    return %c0_i32, %c0_i32_0 : i32, i32
  }
  func.func @transform_9(%arg0: i32) -> (i32, i32) {
    %c0_i32 = arith.constant 0 : i32
    %c0_i32_0 = arith.constant 0 : i32
    return %arg0, %c0_i32 : i32, i32
  }
}

</mosaic_0001>

<bundles_post_ra>
// kernel: bmps_approximator_forward.1
= control target key start
LH: loop header
LB: loop body
LE: loop exit
PB: predicated region body
PF: predicated region fallthrough
CT: control target
= control target key end

     0   :  { %v334_v0 = vmov 0.0   ;;  %vm335_vm0 = vmmov 0   ;;  %vm57_vm1 = vcmask 261120   ;;  %vm176_vm2 = vcmask 1043456   ;;  %s423_s1 = inlined_call_operand.vmem [shape: bf16[32,16], index: 1, kind: input, shape index: {}]   ;;  %s424_s0 = inlined_call_operand.vmem [shape: bf16[8,32], index: 0, kind: input, shape index: {}]   ;;  %s425_s3 = inlined_call_operand.vmem [shape: bf16[16,8], index: 3, kind: input, shape index: {}]   ;;  %s426_s2 = inlined_call_operand.vmem [shape: f32[1,16], index: 2, kind: input, shape index: {}]   ;;  %s427_s5 = inlined_call_operand.vmem [shape: bf16[8,4], index: 5, kind: input, shape index: {}]   ;;  %s428_s7 = inlined_call_operand.vmem [shape: bf16[4,128], index: 7, kind: input, shape index: {}]   ;;  %s429_s4 = inlined_call_operand.vmem [shape: f32[1,8], index: 4, kind: input, shape index: {}]   ;;  %s430_s6 = inlined_call_operand.vmem [shape: f32[1,4], index: 6, kind: input, shape index: {}]   ;;  %s431_s8 = inlined_call_operand.vmem [shape: f32[1,128], index: 8, kind: input, shape index: {}]   ;;  %s432_s9 = inlined_call_operand.vmem [shape: f32[8,128], index: 9, kind: output, shape index: {}]  }
   0x1   :  { %303 = vmatprep.subr.bf16.mxu0 %v334_v0  ;;  %v331_v1 = vld [vmem:[%s423_s1] sm:$0xff]   ;;  %307 = vmatprep.mubr.msk.bf16.mxu0 %vm335_vm0, %v334_v0  ;;  %v332_v2 = vld [vmem:[%s423_s1 + $0x8] sm:$0xff]   ;;  %vm118_vm3 = vcmask 130048   ;;  %vm234_vm4 = vcmask 1041408   ;;  %vm172_vm5 = vcmask 64512   ;;  %vm230_vm6 = vcmask 31744  }
   0x2   :  { %311 = vmatprep.subr.bf16.mxu1 %v334_v0  ;;  %313 = vmatprep.mubr.msk.bf16.mxu1 %vm335_vm0, %v334_v0  ;;  %v33_v3 = vld [vmem:[%s424_s0] sm:$0xf] }
   0x3   :  { %304 = vmatpush3.bf16.msra.mxu0 %v331_v1  ;;  %v333_v4 = vld [vmem:[%s425_s3] sm:$0xff]  }
   0x4   :  { %305 = vmatprep.subr.bf16.mxu0 %v334_v0  ;;  %312 = vmatpush3.bf16.msra.mxu1 %v333_v4  ;;  %v283_v5 = vld [vmem:[%s426_s2] ss:$0 sm:$0xff] }
   0x5   :  { %317 = vmatprep.subr.bf16.mxu1 %v334_v0  ;;  %v164_v10 = vld [vmem:[%s427_s5] sm:$0xf] }
   0x6   :  { %v178_v14 = vsel %vm176_vm2, %v164_v10, 0  ;;  %v222_v15 = vld [vmem:[%s428_s7] sm:$0x3] }
   0x7   :  { %306 = vmatpush3.bf16.msra.mxu0 %v332_v2  ;;  %v236_v16 = vsel %vm234_vm4, %v222_v15, 0  ;;  %v287_v17 = vld [vmem:[%s429_s4] ss:$0 sm:$0xff] }
   0x8   :  { %323 = vmatprep.subr.bf16.mxu0 %v334_v0  ;;  %v290_v25 = vld [vmem:[%s430_s6] ss:$0 sm:$0xff] }
   0x9   :  { %v292_v33 = vld [vmem:[%s431_s8] ss:$0 sm:$0xff] }
   0xa   :  { %308 = vmatmul.mubr.msk.bf16.vlgmr.msra.gmra.mrb[0].mxu0 %vm57_vm1, %v33_v3 }
   0xb   :  { %325 = vmatprep.mubr.msk.bf16.mxu0 %vm335_vm0, %v334_v0  ;;  %324 = vmatpush3.bf16.msra.mxu0 %v236_v16 }
  0xdd   :  { %v95_v6 = vpop.f32.mrb[0].mxu0 }
  0xde   :  { %v96_v7 = vadd.f32 %v283_v5, %v95_v6  ;;  %v309_v8 = vpop.f32.mrb[1].mxu0 }
  0xdf   :  { %v98_v9 = vpop.f32.mrb[2].mxu0 }
  0xe0   :  { %v101_v11 = vmax.f32 %v96_v7, 0.0  ;;  %v310_v12 = vpop.f32.mrb[3].mxu0 }
  0xe2   :  { %v102_v13 = vpack.c.bf16 %v101_v11, %v101_v11 }
  0xe4   :  { %314 = vmatmul.mubr.msk.bf16.vlgmr.msra.gmra.mrb[0].mxu1 %vm118_vm3, %v102_v13 }
  0xe5   :  { %318 = vmatpush3.bf16.msra.mxu1 %v178_v14  ;;  %319 = vmatprep.mubr.msk.bf16.mxu1 %vm335_vm0, %v334_v0 }
 0x1b7   :  { %v156_v18 = vpop.f32.mrb[0].mxu1 }
 0x1b8   :  { %v157_v19 = vadd.f32 %v287_v17, %v156_v18  ;;  %v315_v20 = vpop.f32.mrb[1].mxu1 }
 0x1b9   :  { %v159_v21 = vpop.f32.mrb[2].mxu1 }
 0x1ba   :  { %v162_v22 = vmax.f32 %v157_v19, 0.0  ;;  %v316_v23 = vpop.f32.mrb[3].mxu1 }
 0x1bc   :  { %v163_v24 = vpack.c.bf16 %v162_v22, %v162_v22 }
 0x1be   :  { %320 = vmatmul.mubr.msk.bf16.vlgmr.msra.gmra.mrb[4].mxu1 %vm172_vm5, %v163_v24 }
 0x291   :  { %v214_v26 = vpop.f32.mrb[4].mxu1 }
 0x292   :  { %v215_v27 = vadd.f32 %v290_v25, %v214_v26  ;;  %v321_v28 = vpop.f32.mrb[5].mxu1 }
 0x293   :  { %v217_v29 = vpop.f32.mrb[6].mxu1 }
 0x294   :  { %v220_v30 = vmax.f32 %v215_v27, 0.0  ;;  %v322_v31 = vpop.f32.mrb[7].mxu1 }
 0x296   :  { %v221_v32 = vpack.c.bf16 %v220_v30, %v220_v30 }
 0x298   :  { %326 = vmatmul.mubr.msk.bf16.vlgmr.msra.gmra.mrb[4].mxu0 %vm230_vm6, %v221_v32 }
 0x36b   :  { %v272_v34 = vpop.f32.mrb[4].mxu0 }
 0x36c   :  { %v273_v35 = vadd.f32 %v292_v33, %v272_v34  ;;  %v327_v36 = vpop.f32.mrb[5].mxu0 }
 0x36d   :  { %v275_v37 = vpop.f32.mrb[6].mxu0 }
 0x36e   :  { %278 = vst [vmem:[%s432_s9] sm:$0xff] %v273_v35  ;;  %v328_v38 = vpop.f32.mrb[7].mxu0 }

</bundles_post_ra>
